<compile_context>
chip_gen: v6e
topology: v6e:2x2x1
jax: 0.10.0
libtpu: 0.0.40
codegen_flags: <defaults>
</compile_context>

<pallas_src>
import jax
import jax.numpy as jnp
from jax.experimental import pallas as pl
from jax.experimental.pallas import tpu as pltpu


# Below this many elements a kernel launch is pure overhead for zero work.
_TINY_INPUT_ELEMENTS = 256

_LANES = 128            # vreg lane width; last dim of the copy tiles
_BIG_TILE_ROWS = 256    # 256 x 128 f32 = 128 KiB per tile (double-buffered)
_SMALL_TILE_ROWS = 32   # minimum sublane-aligned tile for small inputs


def _identity_alias_kernel(x_hbm_ref, o_hbm_ref, flag_ref):
    """NoneFrontEnd.forward: identity via output<-input aliasing.

    The output buffer aliases the input buffer (input_output_aliases={0: 0}),
    so the forward pass requires no data movement and no FLOPs. Both tensor
    refs live in HBM (pl.ANY) and are intentionally untouched. The single SMEM
    scalar store only keeps the lowered kernel body non-trivial — it touches no
    tensor data and costs ~one scalar bundle.
    """
    del x_hbm_ref, o_hbm_ref  # aliased; nothing to move
    flag_ref[0] = jnp.int32(1)


def _copy_tile_kernel(x_ref, o_ref):
    """Lane-dense VMEM tile copy (used only when a fresh buffer is requested)."""
    o_ref[...] = x_ref[...]


def _aliased_identity(x: jax.Array) -> jax.Array:
    return pl.pallas_call(
        _identity_alias_kernel,
        out_shape=jax.ShapeDtypeStruct(x.shape, x.dtype),
        in_specs=[pl.BlockSpec(memory_space=pl.ANY)],   # raw HBM ref, no auto-DMA
        out_specs=pl.BlockSpec(memory_space=pl.ANY),    # raw HBM ref, no auto-DMA
        scratch_shapes=[pltpu.SMEM((1,), jnp.int32)],
        input_output_aliases={0: 0},  # output aliases input -> no copy issued
    )(x)


def _materializing_copy(x: jax.Array) -> jax.Array:
    """Identity that produces a distinct output buffer via a tiled Pallas copy."""
    n = x.size
    block_rows = _BIG_TILE_ROWS if n >= _BIG_TILE_ROWS * _LANES else _SMALL_TILE_ROWS
    tile_elems = block_rows * _LANES
    n_tiles = pl.cdiv(n, tile_elems)
    padded_n = n_tiles * tile_elems

    flat = x.reshape(-1)
    if padded_n != n:
        # Pad only when the flattened size is not tile-aligned; for aligned
        # inputs this path is zero extra copies in the wrapper.
        flat = jnp.pad(flat, (0, padded_n - n))
    flat2d = flat.reshape(padded_n // _LANES, _LANES)  # lane-dense layout

    out2d = pl.pallas_call(
        _copy_tile_kernel,
        out_shape=jax.ShapeDtypeStruct(flat2d.shape, flat2d.dtype),
        grid=(n_tiles,),
        in_specs=[pl.BlockSpec((block_rows, _LANES), lambda i: (i, 0))],
        out_specs=pl.BlockSpec((block_rows, _LANES), lambda i: (i, 0)),
        compiler_params=pltpu.CompilerParams(
            dimension_semantics=("parallel",)),
    )(flat2d)

    return out2d.reshape(-1)[:n].reshape(x.shape)


def none_front_end_forward(x, *, materialize_copy: bool = False) -> jax.Array:
    """Pallas implementation of NoneFrontEnd.forward: returns input unchanged.

    materialize_copy=False (default): zero-copy aliased pass-through.
    materialize_copy=True: lane-dense tiled HBM->VMEM->HBM copy into a fresh
    output buffer.
    """
    x = jnp.asarray(x)

    # Scalars / short vectors: skip the pallas_call entirely — kernel launch
    # overhead would be 100% of the cost for zero work.
    if x.ndim == 0 or x.size <= _TINY_INPUT_ELEMENTS:
        return x

    if materialize_copy:
        return _materializing_copy(x)
    return _aliased_identity(x)


def get_output_vectors_dimension(input_dimensions):
    # Mirrors NoneFrontEnd.get_output_vectors_dimension.
    return input_dimensions


if __name__ == "__main__":
    key = jax.random.PRNGKey(0)
    # Small NCHW-style input consistent with an audio front-end pass-through.
    x = jax.random.normal(key, (2, 4, 16, 16), dtype=jnp.float32)

    # Default (aliased, zero-copy) path.
    y = none_front_end_forward(x)
    y = jax.block_until_ready(y)
    assert y.shape == x.shape
    assert y.dtype == x.dtype
    assert bool(jnp.array_equal(y, x))

    # Materializing-copy path (fresh output buffer, lane-dense tiled copy).
    y2 = none_front_end_forward(x, materialize_copy=True)
    y2 = jax.block_until_ready(y2)
    assert y2.shape == x.shape
    assert y2.dtype == x.dtype
    assert bool(jnp.array_equal(y2, x))

    # Tiny-input fast path (pure identity, no kernel launch).
    v = jax.random.normal(key, (8,), dtype=jnp.float32)
    assert bool(jnp.array_equal(none_front_end_forward(v), v))

    # Shape helper mirrors the PyTorch module.
    assert get_output_vectors_dimension((2, 4, 16, 16)) == (2, 4, 16, 16)

    print("KERNEL_OK")
</pallas_src>

<mosaic_0001>
module attributes {stable_mosaic.version = 11 : i64} {
  func.func @_identity_alias_kernel(%arg0: memref<2x4x16x16xf32, #tpu.memory_space<any>>, %arg1: memref<2x4x16x16xf32, #tpu.memory_space<any>>, %arg2: memref<1xi32, #tpu.memory_space<smem>>) attributes {dimension_semantics = [], scalar_prefetch = 0 : i64, scratch_operands = 1 : i64, tpu.core_type = #tpu.core_type<tc>} {
    %c1_i32 = arith.constant 1 : i32
    %c0 = arith.constant 0 : index
    %0 = memref.load %arg2[%c0] : memref<1xi32, #tpu.memory_space<smem>>
    memref.store %c1_i32, %arg2[%c0] : memref<1xi32, #tpu.memory_space<smem>>
    return
  }
}

</mosaic_0001>

<bundles_post_ra>
// kernel: tpu_custom_call.1
= control target key start
LH: loop header
LB: loop body
LE: loop exit
PB: predicated region body
PF: predicated region fallthrough
CT: control target
= control target key end

     0   :  { %s18_s0 = inlined_call_operand.hbm [shape: f32[2,4,16,16], index: 0, kind: input, shape index: {}, may-alias: {0,1}]   ;;  %s19_s1 = inlined_call_operand.hbm [shape: f32[2,4,16,16], index: 1, kind: output, shape index: {}, may-alias: {0,1}]  }

</bundles_post_ra>
